<compile_context>
chip_gen: v7x
topology: tpu7x:2x2x1
jax: 0.10.0
libtpu: 0.0.40
codegen_flags: <defaults>
</compile_context>

<pallas_src>
import math

import jax
import jax.numpy as jnp
from jax.experimental import pallas as pl
from jax.experimental.pallas import tpu as pltpu


def _pick_tile(dim, max_tile, granule):
    """Largest multiple of `granule` <= max_tile that divides `dim`; else `dim`.

    Falling back to `dim` is always a legal TPU block (equals the full array
    dim), so no padding / masking is ever needed.
    """
    cap = min(max_tile, dim)
    t = (cap // granule) * granule
    while t >= granule:
        if dim % t == 0:
            return t
        t -= granule
    return dim


def _attention_kernel(q_ref, k_ref, v_ref, b_ref, o_ref, m_sc, l_sc, acc_sc):
    kv = pl.program_id(3)

    @pl.when(kv == 0)
    def _init():
        m_sc[...] = jnp.full_like(m_sc, -jnp.inf)
        l_sc[...] = jnp.zeros_like(l_sc)
        acc_sc[...] = jnp.zeros_like(acc_sc)

    # QK^T: contract the last dims of both operands (no K relayout), bf16
    # operands with f32 accumulation.  The 1/sqrt(D) softmax scale was folded
    # into q by the wrapper cast.
    s = jax.lax.dot_general(
        q_ref[...], k_ref[...],
        dimension_numbers=(((1,), (1,)), ((), ())),
        preferred_element_type=jnp.float32)
    s = s + b_ref[...].astype(jnp.float32)

    # Online softmax update, guarded against rows that are fully -inf (masking
    # bias): if m_new == -inf, use 0 as the subtraction reference so exp() gives
    # exact zeros instead of NaNs.
    m_prev = m_sc[...]
    m_new = jnp.maximum(m_prev, jnp.max(s, axis=-1, keepdims=True))
    m_safe = jnp.where(m_new == -jnp.inf, 0.0, m_new)
    alpha = jnp.exp(m_prev - m_safe)
    p = jnp.exp(s - m_safe)
    l_sc[...] = alpha * l_sc[...] + jnp.sum(p, axis=-1, keepdims=True)
    acc_sc[...] = alpha * acc_sc[...] + jnp.dot(
        p.astype(v_ref.dtype), v_ref[...], preferred_element_type=jnp.float32)
    m_sc[...] = m_new

    @pl.when(kv == pl.num_programs(3) - 1)
    def _finalize():
        inv_l = pl.reciprocal(l_sc[...], approx=True)
        o_ref[...] = (acc_sc[...] * inv_l).astype(o_ref.dtype)


def distributed_attention(query, key, value, attn_bias, *, block_q=512,
                          block_kv=512, compute_dtype=jnp.bfloat16):
    """Forward of DistributedAttention (single-rank / eval path).

    query/key/value: [B, S, H, D]; attn_bias: [B, H, S, S] -> out: [B, S, H, D]
    """
    B, S, H, D = query.shape
    assert attn_bias.shape == (B, H, S, S)
    out_dtype = query.dtype
    scale = 1.0 / math.sqrt(D)

    # Tiles chosen to divide S exactly: no padded HBM copies, no in-kernel
    # masking.  tq is a multiple of 8 (sublane); tkv a multiple of 128 (it is
    # the minor dim of the bias block).
    tq = _pick_tile(S, block_q, 8)
    tkv = _pick_tile(S, block_kv, 128)
    num_q = S // tq
    num_kv = S // tkv

    # Head-major [B, H, S, D]; cast to the compute dtype (default bf16) so the
    # dominant bias stream and the Q/K/V streams are half-width; fold the
    # softmax scale into the (already required) q cast.
    q = jnp.transpose((query * scale).astype(compute_dtype), (0, 2, 1, 3))
    k = jnp.transpose(key.astype(compute_dtype), (0, 2, 1, 3))
    v = jnp.transpose(value.astype(compute_dtype), (0, 2, 1, 3))
    bias = attn_bias.astype(compute_dtype)

    out = pl.pallas_call(
        _attention_kernel,
        out_shape=jax.ShapeDtypeStruct((B, H, S, D), out_dtype),
        grid_spec=pltpu.PrefetchScalarGridSpec(
            num_scalar_prefetch=0,
            grid=(B, H, num_q, num_kv),
            in_specs=[
                pl.BlockSpec((None, None, tq, D),
                             lambda b, h, qi, kv: (b, h, qi, 0)),
                pl.BlockSpec((None, None, tkv, D),
                             lambda b, h, qi, kv: (b, h, kv, 0)),
                pl.BlockSpec((None, None, tkv, D),
                             lambda b, h, qi, kv: (b, h, kv, 0)),
                pl.BlockSpec((None, None, tq, tkv),
                             lambda b, h, qi, kv: (b, h, qi, kv)),
            ],
            out_specs=pl.BlockSpec((None, None, tq, D),
                                   lambda b, h, qi, kv: (b, h, qi, 0)),
            scratch_shapes=[
                pltpu.VMEM((tq, 1), jnp.float32),   # running max
                pltpu.VMEM((tq, 1), jnp.float32),   # running denom
                pltpu.VMEM((tq, D), jnp.float32),   # output accumulator
            ],
        ),
        compiler_params=pltpu.CompilerParams(
            dimension_semantics=("parallel", "parallel", "parallel", "arbitrary"),
            vmem_limit_bytes=32 * 1024 * 1024,
        ),
    )(q, k, v, bias)

    return jnp.transpose(out, (0, 2, 1, 3))  # [B, S, H, D]


def _reference(query, key, value, attn_bias):
    # pure-JAX (f32) reference of the same local attention
    B, S, H, D = query.shape
    q = jnp.transpose(query, (0, 2, 1, 3)).astype(jnp.float32)
    k = jnp.transpose(key, (0, 2, 1, 3)).astype(jnp.float32)
    v = jnp.transpose(value, (0, 2, 1, 3)).astype(jnp.float32)
    s = jnp.einsum("bhqd,bhkd->bhqk", q, k) / math.sqrt(D) + attn_bias
    p = jax.nn.softmax(s, axis=-1)
    o = jnp.einsum("bhqk,bhkd->bhqd", p, v)
    return jnp.transpose(o, (0, 2, 1, 3)).astype(query.dtype)


if __name__ == "__main__":
    # --- config 1: small shape, single tile, f32 compute path (tight check) ---
    B, S, H, D = 2, 16, 4, 32
    kq, kk, kv_, kb = jax.random.split(jax.random.PRNGKey(0), 4)
    query = jax.random.normal(kq, (B, S, H, D), dtype=jnp.float32)
    key_t = jax.random.normal(kk, (B, S, H, D), dtype=jnp.float32)
    value = jax.random.normal(kv_, (B, S, H, D), dtype=jnp.float32)
    attn_bias = 0.1 * jax.random.normal(kb, (B, H, S, S), dtype=jnp.float32)

    out = distributed_attention(query, key_t, value, attn_bias,
                                compute_dtype=jnp.float32)
    out = jax.block_until_ready(out)
    ref = _reference(query, key_t, value, attn_bias)
    assert out.shape == (B, S, H, D)
    assert jnp.allclose(out, ref, atol=2e-3, rtol=2e-3)

    # --- config 2: multi-block flash tiling, default bf16 compute path ---
    B2, S2, H2, D2 = 1, 512, 2, 32
    ks = jax.random.split(jax.random.PRNGKey(1), 4)
    q2 = jax.random.normal(ks[0], (B2, S2, H2, D2), dtype=jnp.float32)
    k2 = jax.random.normal(ks[1], (B2, S2, H2, D2), dtype=jnp.float32)
    v2 = jax.random.normal(ks[2], (B2, S2, H2, D2), dtype=jnp.float32)
    b2 = 0.1 * jax.random.normal(ks[3], (B2, H2, S2, S2), dtype=jnp.float32)

    out2 = distributed_attention(q2, k2, v2, b2, block_q=128, block_kv=256)
    out2 = jax.block_until_ready(out2)
    ref2 = _reference(q2, k2, v2, b2)
    assert out2.shape == (B2, S2, H2, D2)
    assert jnp.allclose(out2, ref2, atol=2e-2, rtol=5e-2)

    # --- config 3: ragged S (no multiple-of-128 divisor) -> full-tile fallback ---
    B3, S3, H3, D3 = 1, 200, 2, 32
    ks3 = jax.random.split(jax.random.PRNGKey(2), 4)
    q3 = jax.random.normal(ks3[0], (B3, S3, H3, D3), dtype=jnp.float32)
    k3 = jax.random.normal(ks3[1], (B3, S3, H3, D3), dtype=jnp.float32)
    v3 = jax.random.normal(ks3[2], (B3, S3, H3, D3), dtype=jnp.float32)
    b3 = 0.1 * jax.random.normal(ks3[3], (B3, H3, S3, S3), dtype=jnp.float32)

    out3 = distributed_attention(q3, k3, v3, b3)
    out3 = jax.block_until_ready(out3)
    ref3 = _reference(q3, k3, v3, b3)
    assert out3.shape == (B3, S3, H3, D3)
    assert jnp.allclose(out3, ref3, atol=2e-2, rtol=5e-2)

    print("KERNEL_OK")
</pallas_src>

<mosaic_0001>
module attributes {stable_mosaic.version = 11 : i64} {
  func.func @_attention_kernel(%arg0: i32, %arg1: i32, %arg2: i32, %arg3: i32, %arg4: memref<1x1x16x32xf32, #tpu.memory_space<vmem>>, %arg5: memref<1x1x16x32xf32, #tpu.memory_space<vmem>>, %arg6: memref<1x1x16x32xf32, #tpu.memory_space<vmem>>, %arg7: memref<1x1x16x16xf32, #tpu.memory_space<vmem>>, %arg8: memref<1x1x16x32xf32, #tpu.memory_space<vmem>>, %arg9: memref<16x1xf32, #tpu.memory_space<vmem>>, %arg10: memref<16x1xf32, #tpu.memory_space<vmem>>, %arg11: memref<16x32xf32, #tpu.memory_space<vmem>>) attributes {dimension_semantics = [#tpu.dimension_semantics<parallel>, #tpu.dimension_semantics<parallel>, #tpu.dimension_semantics<parallel>, #tpu.dimension_semantics<arbitrary>], iteration_bounds = array<i64: 2, 4, 1, 1>, scalar_prefetch = 0 : i64, scratch_operands = 3 : i64, tpu.core_type = #tpu.core_type<tc>, window_params = [{transform_indices = @transform_0, window_bounds = array<i64: 1, 1, 16, 32>}, {transform_indices = @transform_1, window_bounds = array<i64: 1, 1, 16, 32>}, {transform_indices = @transform_2, window_bounds = array<i64: 1, 1, 16, 32>}, {transform_indices = @transform_3, window_bounds = array<i64: 1, 1, 16, 16>}, {transform_indices = @transform_4, window_bounds = array<i64: 1, 1, 16, 32>}]} {
    %c0_i32 = arith.constant 0 : i32
    %0 = arith.cmpi eq, %arg3, %c0_i32 : i32
    %1 = arith.extui %0 : i1 to i32
    %c0_i32_0 = arith.constant 0 : i32
    %2 = arith.cmpi ne, %1, %c0_i32_0 : i32
    scf.if %2 {
      %cst_35 = arith.constant 0xFF800000 : f32
      %42 = vector.broadcast %cst_35 : f32 to vector<16x1xf32>
      %c0_36 = arith.constant 0 : index
      %c0_37 = arith.constant 0 : index
      %43 = vector.load %arg9[%c0_36, %c0_37] : memref<16x1xf32, #tpu.memory_space<vmem>>, vector<16x1xf32>
      tpu.vector_store %arg9[%c0_36, %c0_37], %42 {strides = array<i32>} : memref<16x1xf32, #tpu.memory_space<vmem>>, vector<16x1xf32>,
      %cst_38 = arith.constant 0.000000e+00 : f32
      %44 = vector.broadcast %cst_38 : f32 to vector<16x1xf32>
      %c0_39 = arith.constant 0 : index
      %c0_40 = arith.constant 0 : index
      %45 = vector.load %arg10[%c0_39, %c0_40] : memref<16x1xf32, #tpu.memory_space<vmem>>, vector<16x1xf32>
      tpu.vector_store %arg10[%c0_39, %c0_40], %44 {strides = array<i32>} : memref<16x1xf32, #tpu.memory_space<vmem>>, vector<16x1xf32>,
      %cst_41 = arith.constant 0.000000e+00 : f32
      %46 = vector.broadcast %cst_41 : f32 to vector<16x32xf32>
      %c0_42 = arith.constant 0 : index
      %c0_43 = arith.constant 0 : index
      %47 = vector.load %arg11[%c0_42, %c0_43] : memref<16x32xf32, #tpu.memory_space<vmem>>, vector<16x32xf32>
      tpu.vector_store %arg11[%c0_42, %c0_43], %46 {strides = array<i32>} : memref<16x32xf32, #tpu.memory_space<vmem>>, vector<16x32xf32>,
    } else {
    }
    %c0 = arith.constant 0 : index
    %c0_1 = arith.constant 0 : index
    %c0_2 = arith.constant 0 : index
    %c0_3 = arith.constant 0 : index
    %3 = vector.load %arg4[%c0, %c0_1, %c0_2, %c0_3] : memref<1x1x16x32xf32, #tpu.memory_space<vmem>>, vector<1x1x16x32xf32>
    %4 = vector.shape_cast %3 : vector<1x1x16x32xf32> to vector<16x32xf32>
    %c0_4 = arith.constant 0 : index
    %c0_5 = arith.constant 0 : index
    %c0_6 = arith.constant 0 : index
    %c0_7 = arith.constant 0 : index
    %5 = vector.load %arg5[%c0_4, %c0_5, %c0_6, %c0_7] : memref<1x1x16x32xf32, #tpu.memory_space<vmem>>, vector<1x1x16x32xf32>
    %6 = vector.shape_cast %5 : vector<1x1x16x32xf32> to vector<16x32xf32>
    %cst = arith.constant dense<0.000000e+00> : vector<16x16xf32>
    %7 = tpu.matmul %4, %6, %cst {dimension_numbers = #tpu.dot_dimension_numbers<[1], [1], [0], [0], [0, 0, 1, 0], [], []>} : vector<16x32xf32>, vector<16x32xf32>, vector<16x16xf32> -> vector<16x16xf32>
    %c0_8 = arith.constant 0 : index
    %c0_9 = arith.constant 0 : index
    %c0_10 = arith.constant 0 : index
    %c0_11 = arith.constant 0 : index
    %8 = vector.load %arg7[%c0_8, %c0_9, %c0_10, %c0_11] : memref<1x1x16x16xf32, #tpu.memory_space<vmem>>, vector<1x1x16x16xf32>
    %9 = vector.shape_cast %8 : vector<1x1x16x16xf32> to vector<16x16xf32>
    %10 = arith.addf %7, %9 : vector<16x16xf32>
    %c0_12 = arith.constant 0 : index
    %c0_13 = arith.constant 0 : index
    %11 = vector.load %arg9[%c0_12, %c0_13] : memref<16x1xf32, #tpu.memory_space<vmem>>, vector<16x1xf32>
    %cst_14 = arith.constant dense<0xFF800000> : vector<16xf32>
    %12 = vector.multi_reduction <maximumf>, %10, %cst_14 [1] : vector<16x16xf32> to vector<16xf32>
    %13 = vector.shape_cast %12 : vector<16xf32> to vector<16x1xf32>
    %14 = arith.maximumf %11, %13 : vector<16x1xf32>
    %cst_15 = arith.constant 0xFF800000 : f32
    %15 = vector.broadcast %cst_15 : f32 to vector<16x1xf32>
    %16 = arith.cmpf oeq, %14, %15 : vector<16x1xf32>
    %cst_16 = arith.constant 0.000000e+00 : f32
    %17 = vector.broadcast %cst_16 : f32 to vector<16x1xf32>
    %18 = arith.select %16, %17, %14 : vector<16x1xi1>, vector<16x1xf32>
    %19 = arith.subf %11, %18 : vector<16x1xf32>
    %20 = math.exp %19 : vector<16x1xf32>
    %21 = vector.broadcast %18 : vector<16x1xf32> to vector<16x16xf32>
    %22 = arith.subf %10, %21 : vector<16x16xf32>
    %23 = math.exp %22 : vector<16x16xf32>
    %c0_17 = arith.constant 0 : index
    %c0_18 = arith.constant 0 : index
    %24 = vector.load %arg10[%c0_17, %c0_18] : memref<16x1xf32, #tpu.memory_space<vmem>>, vector<16x1xf32>
    %25 = arith.mulf %20, %24 : vector<16x1xf32>
    %cst_19 = arith.constant dense<0.000000e+00> : vector<16xf32>
    %26 = vector.multi_reduction <add>, %23, %cst_19 [1] : vector<16x16xf32> to vector<16xf32>
    %27 = vector.shape_cast %26 : vector<16xf32> to vector<16x1xf32>
    %28 = arith.addf %25, %27 : vector<16x1xf32>
    %c0_20 = arith.constant 0 : index
    %c0_21 = arith.constant 0 : index
    %29 = vector.load %arg10[%c0_20, %c0_21] : memref<16x1xf32, #tpu.memory_space<vmem>>, vector<16x1xf32>
    tpu.vector_store %arg10[%c0_20, %c0_21], %28 {strides = array<i32>} : memref<16x1xf32, #tpu.memory_space<vmem>>, vector<16x1xf32>,
    %c0_22 = arith.constant 0 : index
    %c0_23 = arith.constant 0 : index
    %30 = vector.load %arg11[%c0_22, %c0_23] : memref<16x32xf32, #tpu.memory_space<vmem>>, vector<16x32xf32>
    %31 = vector.broadcast %20 : vector<16x1xf32> to vector<16x32xf32>
    %32 = arith.mulf %31, %30 : vector<16x32xf32>
    %c0_24 = arith.constant 0 : index
    %c0_25 = arith.constant 0 : index
    %c0_26 = arith.constant 0 : index
    %c0_27 = arith.constant 0 : index
    %33 = vector.load %arg6[%c0_24, %c0_25, %c0_26, %c0_27] : memref<1x1x16x32xf32, #tpu.memory_space<vmem>>, vector<1x1x16x32xf32>
    %34 = vector.shape_cast %33 : vector<1x1x16x32xf32> to vector<16x32xf32>
    %cst_28 = arith.constant dense<0.000000e+00> : vector<16x32xf32>
    %35 = tpu.matmul %23, %34, %cst_28 {dimension_numbers = #tpu.dot_dimension_numbers<[1], [0], [0], [1], [0, 0, 1, 1], [], []>} : vector<16x16xf32>, vector<16x32xf32>, vector<16x32xf32> -> vector<16x32xf32>
    %36 = arith.addf %32, %35 : vector<16x32xf32>
    %c0_29 = arith.constant 0 : index
    %c0_30 = arith.constant 0 : index
    %37 = vector.load %arg11[%c0_29, %c0_30] : memref<16x32xf32, #tpu.memory_space<vmem>>, vector<16x32xf32>
    tpu.vector_store %arg11[%c0_29, %c0_30], %36 {strides = array<i32>} : memref<16x32xf32, #tpu.memory_space<vmem>>, vector<16x32xf32>,
    %c0_31 = arith.constant 0 : index
    %c0_32 = arith.constant 0 : index
    %38 = vector.load %arg9[%c0_31, %c0_32] : memref<16x1xf32, #tpu.memory_space<vmem>>, vector<16x1xf32>
    tpu.vector_store %arg9[%c0_31, %c0_32], %14 {strides = array<i32>} : memref<16x1xf32, #tpu.memory_space<vmem>>, vector<16x1xf32>,
    %c0_i32_33 = arith.constant 0 : i32
    %39 = arith.cmpi eq, %arg3, %c0_i32_33 : i32
    %40 = arith.extui %39 : i1 to i32
    %c0_i32_34 = arith.constant 0 : i32
    %41 = arith.cmpi ne, %40, %c0_i32_34 : i32
    scf.if %41 {
      %c0_35 = arith.constant 0 : index
      %c0_36 = arith.constant 0 : index
      %42 = vector.load %arg10[%c0_35, %c0_36] : memref<16x1xf32, #tpu.memory_space<vmem>>, vector<16x1xf32>
      %43 = tpu.reciprocal %42 {approx = true} : vector<16x1xf32> -> vector<16x1xf32>
      %c0_37 = arith.constant 0 : index
      %c0_38 = arith.constant 0 : index
      %44 = vector.load %arg11[%c0_37, %c0_38] : memref<16x32xf32, #tpu.memory_space<vmem>>, vector<16x32xf32>
      %45 = vector.broadcast %43 : vector<16x1xf32> to vector<16x32xf32>
      %46 = arith.mulf %44, %45 : vector<16x32xf32>
      %c0_39 = arith.constant 0 : index
      %c0_40 = arith.constant 0 : index
      %c0_41 = arith.constant 0 : index
      %c0_42 = arith.constant 0 : index
      %47 = vector.load %arg8[%c0_39, %c0_40, %c0_41, %c0_42] : memref<1x1x16x32xf32, #tpu.memory_space<vmem>>, vector<1x1x16x32xf32>
      %48 = vector.shape_cast %47 : vector<1x1x16x32xf32> to vector<16x32xf32>
      %49 = vector.shape_cast %46 : vector<16x32xf32> to vector<1x1x16x32xf32>
      tpu.vector_store %arg8[%c0_39, %c0_40, %c0_41, %c0_42], %49 {strides = array<i32>} : memref<1x1x16x32xf32, #tpu.memory_space<vmem>>, vector<1x1x16x32xf32>,
    } else {
    }
    return
  }
  func.func @transform_0(%arg0: i32, %arg1: i32, %arg2: i32, %arg3: i32) -> (i32, i32, i32, i32) {
    %c0_i32 = arith.constant 0 : i32
    %c0_i32_0 = arith.constant 0 : i32
    return %arg0, %arg1, %arg2, %c0_i32 : i32, i32, i32, i32
  }
  func.func @transform_1(%arg0: i32, %arg1: i32, %arg2: i32, %arg3: i32) -> (i32, i32, i32, i32) {
    %c0_i32 = arith.constant 0 : i32
    %c0_i32_0 = arith.constant 0 : i32
    return %arg0, %arg1, %arg3, %c0_i32 : i32, i32, i32, i32
  }
  func.func @transform_2(%arg0: i32, %arg1: i32, %arg2: i32, %arg3: i32) -> (i32, i32, i32, i32) {
    %c0_i32 = arith.constant 0 : i32
    %c0_i32_0 = arith.constant 0 : i32
    return %arg0, %arg1, %arg3, %c0_i32 : i32, i32, i32, i32
  }
  func.func @transform_3(%arg0: i32, %arg1: i32, %arg2: i32, %arg3: i32) -> (i32, i32, i32, i32) {
    %c0_i32 = arith.constant 0 : i32
    return %arg0, %arg1, %arg2, %arg3 : i32, i32, i32, i32
  }
  func.func @transform_4(%arg0: i32, %arg1: i32, %arg2: i32, %arg3: i32) -> (i32, i32, i32, i32) {
    %c0_i32 = arith.constant 0 : i32
    %c0_i32_0 = arith.constant 0 : i32
    return %arg0, %arg1, %arg2, %c0_i32 : i32, i32, i32, i32
  }
}

</mosaic_0001>

<bundles_post_ra>
// kernel: tpu_custom_call.1
= control target key start
LH: loop header
LB: loop body
LE: loop exit
PB: predicated region body
PF: predicated region fallthrough
CT: control target
= control target key end

     0   :  { %s1709_s0 = inlined_call_operand.hbm [shape: f32[2,4,16,32], index: 0, kind: input, shape index: {}]   ;;  %s1710_s1 = inlined_call_operand.hbm [shape: f32[2,4,16,32], index: 1, kind: input, shape index: {}]   ;;  %s1711_s2 = inlined_call_operand.hbm [shape: f32[2,4,16,32], index: 2, kind: input, shape index: {}]   ;;  %s1712_s3 = inlined_call_operand.hbm [shape: f32[2,4,16,16], index: 3, kind: input, shape index: {}]   ;;  %s1713_s4 = inlined_call_operand.hbm [shape: f32[2,4,16,32], index: 4, kind: output, shape index: {}]  }
   0x1   :  { %1725 = sst [smem:[#allocation24_spill]] %s1709_s0 }
   0x2   :  { %1726 = sst [smem:[#allocation25_spill]] %s1710_s1 }
   0x3   :  { %9 = vsyncpa [#allocation6], 0 }
   0x4   :  { %11 = vsyncpa [#allocation6 + $0x1], 0 }
   0x5   :  { %12 = vsyncpa [#allocation9], 0 }
   0x6   :  { %14 = vsyncpa [#allocation9 + $0x1], 0 }
   0x7   :  { %15 = vsyncpa [#allocation12], 0 }
   0x8   :  { %17 = vsyncpa [#allocation12 + $0x1], 0 }
   0x9   :  { %18 = vsyncpa [#allocation7], 0 }
   0xa   :  { %20 = vsyncpa [#allocation7 + $0x1], 0  ;;  %s1336_s15 = smov 0   ;;  %s1338_s16 = smov 0  }
   0xb   :  { %s1340_s17 = smov 0   ;;  %s1342_s18 = smov 0  }
   0xc   :  { %s1344_s19 = smov 0   ;;  %s1346_s20 = smov 0  }
   0xd   :  { %s1348_s21 = smov 0   ;;  %s1350_s22 = smov 0  }
   0xe LB: > { %1727 = sst [smem:[#allocation18_spill]] %s1277_s17  ;;  %s1377_s23 = sadd.s32 4294967295, %s1297_s22   ;;  %s1297_s22 = sphi %s1350_s22, %s26_s22   ;;  %s1293_s21 = sphi %s1348_s21, %s1754_s21   ;;  %s1289_s20 = sphi %s1346_s20, %s1758_s20   ;;  %s1285_s19 = sphi %s1344_s19, %s1752_s19   ;;  %s1281_s18 = sphi %s1342_s18, %s1751_s18   ;;  %s1277_s17 = sphi %s1340_s17, %s1757_s17   ;;  %s1273_s16 = sphi %s1338_s16, %s1756_s16   ;;  %s1269_s15 = sphi %s1336_s15, %s1755_s15  }
   0xf   : > { %1728 = sst [smem:[#allocation19_spill]] %s1289_s20  ;;  %s888_s24 = sadd.s32 4294967294, %s1297_s22  }
  0x10   : > { %1729 = sst [smem:[#allocation20_spill]] %s1293_s21  ;;  %s48_s25 = sadd.s32 1, %s1289_s20 }
  0x11   : > { %s52_s26 = sadd.s32 1, %s1293_s21  ;;  %p50_p0 = scmp.ge.s32.totalorder %s48_s25, 4 }
  0x12   : > { %s63_s27 = sadd.s32 1, %s1277_s17  ;;  %p70_p1 = scmp.ne.s32.totalorder %s1277_s17, %s1273_s16 }
  0x13   : > { %p71_p2 = scmp.eq.s32.totalorder %s1297_s22, 0  ;;  %s1760_s25 = smov (%p50_p0, %s48_s25), 0 }
  0x14   : > { %1730 = sst [smem:[#allocation21_spill]] %s1760_s25  ;;  %s1762_s26 = smov (!%p50_p0, %s52_s26), %s1293_s21 }
  0x15   : > { %s57_s28 = ssub.s32 %s1289_s20, %s1760_s25  ;;  %p1391_p3 = por %p71_p2, %p70_p1 }
  0x16   : > { %p54_p4 = scmp.ge.s32.totalorder %s1762_s26, 2  ;;  %p76_p5 = scmp.ne.s32.totalorder %s1273_s16, %s1269_s15 }
  0x17   : > { %p77_p6 = scmp.eq.s32.totalorder %s1377_s23, 0  ;;  %p196_p7 = scmp.eq.s32.totalorder %s1377_s23, 7 }
  0x18   : > { %s1764_s26 = smov (%p54_p4, %s1762_s26), 0  ;;  %p202_p10 = scmp.eq.s32.totalorder %s888_s24, 7 }
  0x19   : > { %1732 = sst [smem:[#allocation22_spill]] %s1764_s26  ;;  %p1401_p8 = por %p77_p6, %p76_p5 }
  0x1a   : > { %p1405_p9 = por %p196_p7, %p70_p1  ;;  %s56_s6 = ssub.s32 %s1293_s21, %s1764_s26 }
  0x1b   : > { %s1733_s30 = scalar_select %p1401_p8, 1, 0 }
  0x1c   : > { %s1734_s5 = scalar_select %p1405_p9, 1, 0 }
  0x1d   : > { %s58_s7 = sor.u32 %s57_s28, %s56_s6  ;;  %p1411_p12 = por %p202_p10, %p76_p5 }
  0x1e   : > { %p61_p11 = scmp.eq.s32.totalorder %s58_s7, 0  ;;  %p984_p13 = scmp.lt.s32.totalorder %s1297_s22, 8 }
  0x1f   : > { %s1735_s8 = scalar_select %p1411_p12, 1, 0 }
  0x20   : > { %s1417_s9 = sand.u32 1, %s1277_s17   ;;  %s892_s12 = sshll.u32 %s1289_s20, 1 }
  0x21   : > { %s1420_s10 = scalar_select %p61_p11, %s1277_s17, %s63_s27  }
  0x22   : > { %s1423_s11 = sshll.u32 %s1417_s9, 4  ;;  %s893_s13 = sshll.u32 %s1293_s21, 3 }
  0x23   : > { %1736 = sst [smem:[#allocation23_spill]] %s1420_s10  ;;  %p1429_p0 = pnand %p984_p13, %p1391_p3 }
  0x24   : > { %s234_s24 = sadd.s32 %s893_s13, %s892_s12  ;;  %s247_s6 = sand.u32 1, %s1297_s22  }
  0x25   : > { %s1433_s28 = sshll.u32 %s234_s24, 7  ;;  %s1738_s1 = sld [smem:[#allocation25_spill]] }
  0x26   : > { %s251_s29 = scalar_lea.vmem [#allocation8], %s1423_s11  ;;  %s1446_s21 = scalar_lea.sflag [#allocation9], %s247_s6 }
  0x27   : > { %s262_s25 = sshll.u32 %s251_s29, 4  ;;  %p1452_p3 = pneg %p1429_p0  ;;  %s1443_s25 = int_to_ptr.vmem [resolvable:$true] %s262_s25 }
  0x2b   : > { %s1440_s27 = scalar_lea.hbm %s1738_s1, %s1433_s28  ;;  %s1076_s7 = scalar_lea.hbm %s1738_s1, 2048 }
  0x2c   : > { %s1071_s12 = scalar_lea.hbm %s1440_s27, 256  ;;  %p1077_p6 = scmp.lt.u32.totalorder %s1440_s27, %s1738_s1 }
  0x2d   : > { %p1072_p2 = scmp.ne.s32.totalorder %s1440_s27, %s1071_s12  ;;  %p1078_p7 = scmp.lt.u32.totalorder %s1076_s7, %s1071_s12 }
  0x2e   : > { %p1080_p11 = scmp.lt.u32.totalorder %s1071_s12, %s1440_s27 }
  0x2f   : > { %p1074_p4 = pnand %p1452_p3, %p1072_p2  ;;  %p1079_p10 = por %p1078_p7, %p1077_p6 }
  0x31   : > { %p1075_p5 = pneg %p1074_p4  ;;  %p1081_p13 = por %p1080_p11, %p1079_p10 }
  0x33   : > { %p1082_p1 = pnand %p1081_p13, %p1075_p5 }
  0x35   : > { %1085 = shalt.err (!%p1082_p1)
}
  0x36   : > { %s1086_s6 = scalar_lea.vmem %s1443_s25, 256  ;;  %s1299_s26 = smov [#allocation8]  }
  0x37   : > { %p1087_p2 = scmp.ne.s32.totalorder %s1443_s25, %s1086_s6  ;;  %s1091_s24 = sshll.u32 %s1299_s26, 4  ;;  %s1092_s24 = int_to_ptr.vmem [resolvable:$false] %s1091_s24 }
  0x38   : > { %s1093_s20 = scalar_lea.vmem %s1092_s24, 512  ;;  %p1094_p9 = scmp.lt.s32.totalorder %s1443_s25, %s1092_s24 }
  0x39   : > { %p1089_p4 = pnand %p1087_p2, %p1452_p3  ;;  %p1095_p8 = scmp.lt.s32.totalorder %s1093_s20, %s1086_s6 }
  0x3b   : > { %p1090_p12 = pneg %p1089_p4  ;;  %p1096_p6 = por %p1095_p8, %p1094_p9 }
  0x3d   : > { %p1097_p7 = pnand %p1096_p6, %p1090_p12 }
  0x3f   : > { %1100 = shalt.err (!%p1097_p7)
}
  0x40   : > { %s1720_s12 = smov 128   ;;  %s1722_s7 = smov 8  }
  0x41   : > { %973 = dma.hbm_to_vmem [thread:$0]  (!%p1429_p0), %s1440_s27, 256, %s1443_s25, %s1446_s21, %s1720_s12, %s1720_s12, %s1722_s7  }
  0x42   : > { %p321_p8 = scmp.lt.s32.totalorder %s1297_s22, 9  ;;  %p1740_p9 = scmp.ge.s32.totalorder %s1297_s22, 1 }
  0x43   : > { %s1742_s0 = sld [smem:[#allocation24_spill]]  ;;  %s226_s20 = scalar_lea.vmem [#allocation5], %s1423_s11 }
  0x44   : > { %p1482_p12 = pnand %p1740_p9, %p321_p8  ;;  %s237_s1 = sshll.u32 %s226_s20, 4  ;;  %s1493_s1 = int_to_ptr.vmem [resolvable:$true] %s237_s1 }
  0x45   : > { %s223_s25 = scalar_lea.sflag [#allocation6], %s1417_s9 }
  0x46   : > { %s1741_s29 = scalar_select %p1482_p12, 1, 0 }
  0x49   : > { %s1490_s24 = scalar_lea.hbm %s1742_s0, %s1433_s28  ;;  %s1106_s6 = scalar_lea.hbm %s1742_s0, 2048 }
  0x4a   : > { %s1101_s27 = scalar_lea.hbm %s1490_s24, 256  ;;  %p1107_p11 = scmp.lt.u32.totalorder %s1490_s24, %s1742_s0 }
  0x4b   : > { %p1102_p1 = scmp.ne.s32.totalorder %s1490_s24, %s1101_s27  ;;  %p1108_p13 = scmp.lt.u32.totalorder %s1106_s6, %s1101_s27 }
  0x4c   : > { %p1110_p4 = scmp.lt.u32.totalorder %s1101_s27, %s1490_s24 }
  0x4d   : > { %p1104_p5 = pnand %p1102_p1, %p1452_p3  ;;  %p1109_p2 = por %p1108_p13, %p1107_p11 }
  0x4f   : > { %p1105_p10 = pneg %p1104_p5  ;;  %p1111_p6 = por %p1110_p4, %p1109_p2 }
  0x51   : > { %p1112_p7 = pnand %p1111_p6, %p1105_p10 }
  0x53   : > { %1115 = shalt.err (!%p1112_p7)
}
  0x54   : > { %s1116_s20 = scalar_lea.vmem %s1493_s1, 256  ;;  %s1302_s12 = smov [#allocation5]  }
  0x55   : > { %p1117_p8 = scmp.ne.s32.totalorder %s1493_s1, %s1116_s20  ;;  %s1121_s7 = sshll.u32 %s1302_s12, 4  ;;  %s1122_s7 = int_to_ptr.vmem [resolvable:$false] %s1121_s7 }
  0x56   : > { %s1123_s10 = scalar_lea.vmem %s1122_s7, 512  ;;  %p1124_p5 = scmp.lt.s32.totalorder %s1493_s1, %s1122_s7 }
  0x57   : > { %p1119_p9 = pnand %p1117_p8, %p1452_p3  ;;  %p1125_p12 = scmp.lt.s32.totalorder %s1123_s10, %s1116_s20 }
  0x59   : > { %p1120_p1 = pneg %p1119_p9  ;;  %p1126_p11 = por %p1125_p12, %p1124_p5 }
  0x5b   : > { %p1127_p13 = pnand %p1126_p11, %p1120_p1 }
  0x5d   : > { %1130 = shalt.err (!%p1127_p13)
}
  0x5e   : > { %s1743_s27 = smov 8   ;;  %s1744_s6 = smov 128  }
  0x5f   : > { %970 = dma.hbm_to_vmem [thread:$0]  (!%p1429_p0), %s1490_s24, 256, %s1493_s1, %s223_s25, %s1744_s6, %s1744_s6, %s1743_s27  }
  0x60   : > { %s1526_s20 = scalar_lea.hbm %s1711_s2, %s1433_s28  ;;  %s276_s7 = scalar_lea.vmem [#allocation10], %s1423_s11 }
  0x61   : > { %s287_s10 = sshll.u32 %s276_s7, 4  ;;  %s1131_s0 = scalar_lea.hbm %s1526_s20, 256  ;;  %s1529_s10 = int_to_ptr.vmem [resolvable:$true] %s287_s10 }
  0x62   : > { %p1132_p12 = scmp.ne.s32.totalorder %s1526_s20, %s1131_s0  ;;  %s1136_s24 = scalar_lea.hbm %s1711_s2, 2048 }
  0x63   : > { %p1137_p4 = scmp.lt.u32.totalorder %s1526_s20, %s1711_s2  ;;  %p1138_p6 = scmp.lt.u32.totalorder %s1136_s24, %s1131_s0 }
  0x64   : > { %p1134_p10 = pnand %p1132_p12, %p1452_p3  ;;  %p1140_p8 = scmp.lt.u32.totalorder %s1131_s0, %s1526_s20 }
  0x65   : > { %p1139_p7 = por %p1138_p6, %p1137_p4 }
  0x66   : > { %p1135_p2 = pneg %p1134_p10 }
  0x67   : > { %p1141_p9 = por %p1140_p8, %p1139_p7 }
  0x69   : > { %p1142_p1 = pnand %p1141_p9, %p1135_p2 }
  0x6b   : > { %1145 = shalt.err (!%p1142_p1)
}
  0x6c   : > { %s1146_s12 = scalar_lea.vmem %s1529_s10, 256  ;;  %s1303_s17 = smov [#allocation10]  }
  0x6d   : > { %p1147_p5 = scmp.ne.s32.totalorder %s1529_s10, %s1146_s12  ;;  %s1151_s7 = sshll.u32 %s1303_s17, 4  ;;  %s1152_s7 = int_to_ptr.vmem [resolvable:$false] %s1151_s7 }
  0x6e   : > { %s1153_s1 = scalar_lea.vmem %s1152_s7, 512  ;;  %p1154_p12 = scmp.lt.s32.totalorder %s1529_s10, %s1152_s7 }
  0x6f   : > { %p1149_p11 = pnand %p1147_p5, %p1452_p3  ;;  %p1155_p10 = scmp.lt.s32.totalorder %s1153_s1, %s1146_s12 }
  0x71   : > { %p1150_p13 = pneg %p1149_p11  ;;  %p1156_p4 = por %p1155_p10, %p1154_p12 }
  0x73   : > { %p1157_p6 = pnand %p1156_p4, %p1150_p13 }
  0x75   : > { %1160 = shalt.err (!%p1157_p6)
}
  0x76   : > { %976 = dma.hbm_to_vmem [thread:$0]  (!%p1429_p0), %s1526_s20, 256, %s1529_s10, %s1446_s21, %s1744_s6, %s1744_s6, %s1743_s27  }
  0x77   : > { %s1560_s25 = scalar_lea.hbm %s1712_s3, %s1433_s28  ;;  %s301_s26 = scalar_lea.vmem [#allocation11], %s1423_s11 }
  0x78   : > { %s313_s12 = sshll.u32 %s301_s26, 4  ;;  %s298_s17 = scalar_lea.sflag [#allocation12], %s1417_s9  ;;  %s1563_s12 = int_to_ptr.vmem [resolvable:$true] %s313_s12 }
  0x79   : > { %s1161_s7 = scalar_lea.hbm %s1560_s25, 256  ;;  %s1166_s10 = scalar_lea.hbm %s1712_s3, 2048 }
  0x7a   : > { %p1162_p2 = scmp.ne.s32.totalorder %s1560_s25, %s1161_s7  ;;  %p1167_p9 = scmp.lt.u32.totalorder %s1560_s25, %s1712_s3 }
  0x7b   : > { %p1168_p1 = scmp.lt.u32.totalorder %s1166_s10, %s1161_s7  ;;  %p1170_p11 = scmp.lt.u32.totalorder %s1161_s7, %s1560_s25 }
  0x7c   : > { %p1164_p7 = pnand %p1162_p2, %p1452_p3 }
  0x7d   : > { %p1169_p5 = por %p1168_p1, %p1167_p9 }
  0x7e   : > { %p1165_p8 = pneg %p1164_p7 }
  0x7f   : > { %p1171_p13 = por %p1170_p11, %p1169_p5 }
  0x81   : > { %p1172_p12 = pnand %p1171_p13, %p1165_p8 }
  0x83   : > { %1175 = shalt.err (!%p1172_p12)
}
  0x84   : > { %s1176_s11 = scalar_lea.vmem %s1563_s12, 256  ;;  %s1304_s0 = smov [#allocation11]  }
  0x85   : > { %p1177_p10 = scmp.ne.s32.totalorder %s1563_s12, %s1176_s11  ;;  %s1181_s24 = sshll.u32 %s1304_s0, 4  ;;  %s1182_s24 = int_to_ptr.vmem [resolvable:$false] %s1181_s24 }
  0x86   : > { %s1183_s26 = scalar_lea.vmem %s1182_s24, 512  ;;  %p1184_p2 = scmp.lt.s32.totalorder %s1563_s12, %s1182_s24 }
  0x87   : > { %p1179_p4 = pnand %p1177_p10, %p1452_p3  ;;  %p1185_p7 = scmp.lt.s32.totalorder %s1183_s26, %s1176_s11 }
  0x89   : > { %p1180_p6 = pneg %p1179_p4  ;;  %p1186_p9 = por %p1185_p7, %p1184_p2 }
  0x8b   : > { %p1187_p1 = pnand %p1186_p9, %p1180_p6 }
  0x8d   : > { %1190 = shalt.err (!%p1187_p1)
}
  0x8e   : > { %979 = dma.hbm_to_vmem [thread:$0]  (!%p1429_p0), %s1560_s25, 256, %s1563_s12, %s298_s17, %s1744_s6, %s1744_s6, %s1743_s27  }
  0x8f   : > { %p1745_p3 = scmp.ne.s32.totalorder %s1741_s29, 0 }
  0x90   : > { %s1595_s13 = sand.u32 (!%p1745_p3), 1, %s1273_s16   ;;  %p1746_p8 = scmp.ne.s32.totalorder (!%p1745_p3), %s1733_s30, 0 }
  0x91   : > { %325 = sbr.rel (%p1745_p3) target bundleno = 988 (0x3dc), region = 36  ;;  %s1598_s7 = sshll.u32 (!%p1745_p3), %s1595_s13, 4 }
  0x92   : > { %s328_s14 = scalar_lea.sflag (!%p1745_p3), [#allocation6], %s1595_s13  ;;  %s331_s21 = scalar_lea.vmem (!%p1745_p3), [#allocation5], %s1598_s7 }
  0x98   : > { %1252 = dma.done.wait (%p1746_p8), %s328_s14, 256  }
  0x99   : > { %1254 = vsyncadd (%p1746_p8), %s328_s14, 4294967040  ;;  %s336_s9 = sand.u32 1, %s1377_s23   ;;  %s340_s27 = scalar_lea.vmem [#allocation8], %s1598_s7 }
  0x9a   : > { %s337_s29 = scalar_lea.sflag [#allocation9], %s336_s9 }
  0x9b   : > { %1256 = dma.done.wait (%p1746_p8), %s337_s29, 512  }
  0x9c   : > { %1258 = vsyncadd (%p1746_p8), %s337_s29, 4294966784  ;;  %s349_s6 = scalar_lea.vmem [#allocation10], %s1598_s7  ;;  %s355_s25 = scalar_lea.sflag [#allocation12], %s1595_s13 }
  0x9d   : > { %s358_s12 = scalar_lea.vmem [#allocation11], %s1598_s7 }
  0x9e   : > { %1260 = dma.done.wait (%p1746_p8), %s355_s25, 256  }
  0x9f   : > { %1262 = vsyncadd (%p1746_p8), %s355_s25, 4294967040  ;;  %vm412_vm0 = vcmask 261120   ;;  %v417_v0 = vld [vmem:[%s340_s27] sm:$0xff]  ;;  %v418_v1 = vld [vmem:[%s340_s27 + $0x8] sm:$0xff]  ;;  %vm407_vm2 = vcmask 7168   ;;  %v1305_v5 = vmov -inf  }
  0xa0   : > { %vm948_vm1 = vmpackc.low %vm412_vm0, %vm412_vm0  ;;  %v415_v2 = vld [vmem:[%s331_s21] sm:$0xff]  ;;  %v947_v3 = vpack.c.bf16 %v418_v1, %v417_v0  ;;  %v416_v4 = vld [vmem:[%s331_s21 + $0x8] sm:$0xff]  ;;  %408 = vst.msk [vmem:[#allocation2] sm:$0xff] %vm407_vm2, %v1305_v5  ;;  %vm511_vm3 = vcmask 130048   ;;  %v1306_v14 = vmov 0   ;;  %v1307_v15 = vmov 0.0  }
  0xa1   : > { %937 = vmatprep.mubr.msk.f32.mxu0 %vm412_vm0, %v415_v2  ;;  %409 = vst.msk [vmem:[#allocation2 + $0x8] sm:$0xff] %vm407_vm2, %v1305_v5  ;;  %v419_v6 = vld [vmem:[%s358_s12] sm:$0xff]  ;;  %v420_v8 = vld [vmem:[%s358_s12 + $0x8] sm:$0xff]  ;;  %1057 = vset.pattern.permute.xlu1 %v1306_v14  ;;  %410 = vst.msk [vmem:[#allocation3] sm:$0xff] %vm407_vm2, %v1307_v15  ;;  %s920_s23 = sshll.u32 %s1281_s18, 1  ;;  %s921_s30 = sshll.u32 %s1285_s19, 3 }
  0xa2   : > { %949 = vmatprep.subr.msk.bf16.mxu0 %vm948_vm1, %v947_v3  ;;  %1058 = vset.pattern.permute.xlu0 %v1306_v14  ;;  %413 = vst.msk [vmem:[#allocation4] sm:$0xff] %vm412_vm0, %v1307_v15  ;;  %414 = vst.msk [vmem:[#allocation4 + $0x8] sm:$0xff] %vm412_vm0, %v1307_v15  ;;  %v575_v26 = vld [vmem:[%s349_s6] sm:$0xff]  ;;  %v576_v27 = vld [vmem:[%s349_s6 + $0x8] sm:$0xff]  ;;  %s702_s17 = sadd.s32 %s921_s30, %s920_s23  ;;  %s397_s20 = scalar_lea.vmem [#allocation13], %s1598_s7 }
  0xa3   : > { %952 = vmatpush3.bf16.xpose.msk.msra.mxu0 %vm948_vm1, %v947_v3  ;;  %411 = vst.msk [vmem:[#allocation3 + $0x8] sm:$0xff] %vm407_vm2, %v1307_v15  ;;  %v953_v28 = vpack.c.bf16 %v576_v27, %v575_v26  ;;  %s705_s10 = sshll.u32 %s397_s20, 4  ;;  %s922_s28 = sshll.u32 %s702_s17, 7  ;;  %s1648_s10 = int_to_ptr.vmem [resolvable:$true] %s705_s10 }
  0xa4   : > { %s1654_s19 = scalar_lea.hbm %s1713_s4, %s922_s28  ;;  %s688_s11 = scalar_lea.sflag [#allocation7], %s1595_s13 }
  0xa5   : > { %954 = vmatprep.subr.bf16.mxu1 %v953_v28  ;;  %s1191_s0 = scalar_lea.vmem %s1648_s10, 256  ;;  %p1747_p5 = scmp.ne.s32.totalorder %s1734_s5, 0 }
  0xa6   : > { %956 = vmatpush3.bf16.msra.mxu1 %v953_v28  ;;  %p1192_p0 = scmp.ne.s32.totalorder %s1648_s10, %s1191_s0  ;;  %s1308_s24 = smov [#allocation13]  }
  0xa7   : > { %v509_v16 = vld [vmem:[#allocation2] sm:$0xff]  ;;  %s1195_s26 = sshll.u32 %s1308_s24, 4  ;;  %s1196_s26 = int_to_ptr.vmem [resolvable:$false] %s1195_s26 }
  0xa8   : > { %v510_v19 = vld [vmem:[#allocation2 + $0x8] sm:$0xff]  ;;  %v546_v43 = vld [vmem:[#allocation3] sm:$0xff]  ;;  %p1193_p11 = pnand %p1192_p0, %p1747_p5  ;;  %s1197_s7 = scalar_lea.vmem %s1196_s26, 512 }
  0xa9   : > { %v562_v55 = vld [vmem:[#allocation4 + $0x8] sm:$0xff]  ;;  %v561_v57 = vld [vmem:[#allocation4] sm:$0xff]  ;;  %p1198_p12 = scmp.lt.s32.totalorder %s1648_s10, %s1196_s26  ;;  %p1199_p10 = scmp.lt.s32.totalorder %s1197_s7, %s1191_s0 }
  0xaa   : > { %938 = vmatmul.mubr.msk.f32.vlgmr.msra.gmra.mrb[0].mxu0 %vm412_vm0, %v416_v4  ;;  %v547_v46 = vld [vmem:[#allocation3 + $0x8] sm:$0xff]  ;;  %p1194_p13 = pneg %p1193_p11 }
  0xab   : > { %p1200_p4 = por %p1199_p10, %p1198_p12 }
  0xad   : > { %p1201_p6 = pnand %p1200_p4, %p1194_p13 }
 0x17d   : > { %v939_v7 = vpop.f32.mrb[0].mxu0 }
 0x17e   : > { %v500_v9 = vpop.f32.mrb[1].mxu0  ;;  %v506_v11 = vadd.f32 %v939_v7, %v420_v8 }
 0x17f   : > { %v501_v10 = vadd.f32 %v500_v9, %v419_v6 }
 0x180   : > { %v515_v13 = vsel %vm511_vm3, %v506_v11, -inf }
 0x181   : > { %v512_v12 = vsel %vm511_vm3, %v501_v10, -inf }
 0x182   : > { %513 = vmax.xlane.f32.xlu0 %v512_v12 }
 0x186   : > { %516 = vmax.xlane.f32.xlu0 %v515_v13 }
 0x20f   : > { %v514_v17 = vpop.xlane.xlu0 %513 }
 0x210   : > { %v518_v18 = vmax.f32 %v509_v16, %v514_v17 }
 0x212   : > { %662 = vst.msk [vmem:[#allocation2] sm:$0xff] %vm407_vm2, %v518_v18  ;;  %vm520_vm4 = vcmp.eq.f32.partialorder %v518_v18, -inf }
 0x213   : > { %v517_v20 = vpop.xlane.xlu0 %516  ;;  %v522_v21 = vsel %vm520_vm4, 0.0, %v518_v18 }
 0x214   : > { %v519_v22 = vmax.f32 %v510_v19, %v517_v20  ;;  %532 = vperm.xlu1 %1057, %v522_v21   ;;  %v524_v23 = vsub.f32 %v509_v16, %v522_v21 }
 0x216   : > { %663 = vst.msk [vmem:[#allocation2 + $0x8] sm:$0xff] %vm407_vm2, %v519_v22  ;;  %vm521_vm5 = vcmp.eq.f32.partialorder %v519_v22, -inf  ;;  %v526_v40 = vmul.f32 1.442695, %v524_v23 }
 0x217   : > { %v523_v24 = vsel %vm521_vm5, 0.0, %v519_v22 }
 0x218   : > { %v525_v25 = vsub.f32 %v510_v19, %v523_v24  ;;  %537 = vperm.xlu1 %1057, %v523_v24  }
 0x21a   : > { %v528_v39 = vmul.f32 1.442695, %v525_v25 }
 0x293   : > { %v533_v29 = vpop.permute.xlu1 %532 }
 0x294   : > { %v540_v30 = vsub.f32 %v501_v10, %v533_v29 }
 0x296   : > { %v542_v31 = vmul.f32 1.442695, %v540_v30 }
 0x297   : > { %v538_v32 = vpop.permute.xlu1 %537 }
 0x298   : > { %1059 = vpow2.f32 %v542_v31  ;;  %v541_v33 = vsub.f32 %v506_v11, %v538_v32 }
 0x29a   : > { %v544_v34 = vmul.f32 1.442695, %v541_v33 }
 0x29c   : > { %1061 = vpow2.f32 %v544_v34 }
 0x29d   : > { %1063 = vpow2.f32 %v528_v39 }
 0x29e   : > { %1065 = vpow2.f32 %v526_v40 }
 0x2a2   : > { %v1060_v35 = vpop.eup %1059 }
 0x2a3   : > { %944 = vmatprep.mubr.msk.f32.mxu1 %vm511_vm3, %v1060_v35  ;;  %v550_v36 = vsel %vm511_vm3, %v1060_v35, 0.0 }
 0x2a4   : > { %551 = vadd.xlane.f32.xlu0 %v550_v36 }
 0x2a6   : > { %v1062_v37 = vpop.eup %1061 }
 0x2a7   : > { %945 = vmatmul.mubr.msk.f32.vlgmr.msra.gmra.mrb[0].mxu1 %vm511_vm3, %v1062_v37  ;;  %v553_v38 = vsel %vm511_vm3, %v1062_v37, 0.0  ;;  %v1064_v41 = vpop.eup %1063 }
 0x2a8   : > { %554 = vadd.xlane.f32.xlu1 %v553_v38  ;;  %v1066_v42 = vpop.eup %1065  ;;  %v549_v48 = vmul.f32 %v1064_v41, %v547_v46 }
 0x2a9   : > { %v548_v44 = vmul.f32 %v1066_v42, %v546_v43 }
 0x2b9   : > { %570 = vperm.xlu1 %1057, %v1064_v41  }
 0x2ba   : > { %565 = vperm.xlu0 %1058, %v1066_v42  }
 0x331   : > { %v552_v45 = vpop.xlane.xlu0 %551 }
 0x332   : > { %v556_v47 = vadd.f32 %v552_v45, %v548_v44 }
 0x334   : > { %559 = vst.msk [vmem:[#allocation3] sm:$0xff] %vm407_vm2, %v556_v47 }
 0x335   : > { %v555_v49 = vpop.xlane.xlu1 %554 }
 0x336   : > { %v557_v50 = vadd.f32 %v555_v49, %v549_v48 }
 0x338   : > { %560 = vst.msk [vmem:[#allocation3 + $0x8] sm:$0xff] %vm407_vm2, %v557_v50 }
 0x339   : > { %v571_v56 = vpop.permute.xlu1 %570  ;;  %v566_v58 = vpop.permute.xlu0 %565 }
 0x33a   : > { %v574_v59 = vmul.f32 %v571_v56, %v562_v55  ;;  %v573_v60 = vmul.f32 %v566_v58, %v561_v57 }
 0x33b   : > { %v667_v51 = vld [vmem:[#allocation3] sm:$0xff] }
 0x33c   : > { %1067 = vrcp.f32 %v667_v51 }
 0x33f   : > { %v668_v52 = vld [vmem:[#allocation3 + $0x8] sm:$0xff] }
 0x340   : > { %1069 = vrcp.f32 %v668_v52 }
 0x346   : > { %v1068_v53 = vpop.eup %1067 }
 0x347   : > { %675 = vperm.xlu0 %1058, %v1068_v53  }
 0x34a   : > { %v1070_v54 = vpop.eup %1069 }
 0x34b   : > { %680 = vperm.xlu0 %1058, %v1070_v54  }
 0x37a   : > { %v946_v61 = vpop.f32.mrb[0].mxu1 }
 0x37b   : > { %v659_v62 = vadd.f32 %v946_v61, %v574_v59  ;;  %v649_v63 = vpop.f32.mrb[1].mxu1 }
 0x37c   : > { %v658_v0 = vadd.f32 %v649_v63, %v573_v60 }
 0x37d   : > { %661 = vst.msk [vmem:[#allocation4 + $0x8] sm:$0xff] %vm412_vm0, %v659_v62 }
 0x37e   : > { %660 = vst.msk [vmem:[#allocation4] sm:$0xff] %vm412_vm0, %v658_v0 }
 0x384   : > { %v672_v4 = vld [vmem:[#allocation4 + $0x8] sm:$0xff] }
 0x385   : > { %v671_v1 = vld [vmem:[#allocation4] sm:$0xff] }
 0x3c6   : > { %v676_v2 = vpop.permute.xlu0 %675 }
 0x3c7   : > { %v683_v3 = vmul.f32 %v676_v2, %v671_v1 }
 0x3c9   : > { %685 = vst.msk [vmem:[%s397_s20] sm:$0xff] %vm412_vm0, %v683_v3 }
 0x3ca   : > { %v681_v5 = vpop.permute.xlu0 %680 }
 0x3cb   : > { %v684_v6 = vmul.f32 %v681_v5, %v672_v4 }
 0x3cd   : > { %686 = vst.msk [vmem:[%s397_s20 + $0x8] sm:$0xff] %vm412_vm0, %v684_v6 }
 0x3ce   : > { %1204 = shalt.err (!%p1201_p6)
}
 0x3cf   : > { %s1205_s14 = scalar_lea.hbm %s1654_s19, 256  ;;  %s1209_s29 = scalar_lea.hbm %s1713_s4, 2048 }
 0x3d0   : > { %p1206_p2 = scmp.ne.s32.totalorder %s1654_s19, %s1205_s14  ;;  %p1210_p1 = scmp.lt.u32.totalorder %s1654_s19, %s1713_s4 }
 0x3d1   : > { %p1211_p3 = scmp.lt.u32.totalorder %s1209_s29, %s1205_s14  ;;  %p1213_p0 = scmp.lt.u32.totalorder %s1205_s14, %s1654_s19 }
 0x3d2   : > { %p1207_p7 = pnand %p1206_p2, %p1747_p5 }
 0x3d3   : > { %p1212_p8 = por %p1211_p3, %p1210_p1 }
 0x3d4   : > { %p1208_p9 = pneg %p1207_p7 }
 0x3d5   : > { %p1214_p11 = por %p1213_p0, %p1212_p8 }
 0x3d7   : > { %p1215_p13 = pnand %p1214_p11, %p1208_p9 }
 0x3d9   : > { %1218 = shalt.err (!%p1215_p13)
}
 0x3da   : > { %s1309_s25 = smov 128   ;;  %s1310_s12 = smov 8  }
 0x3db   : > { %965 = dma.vmem_to_hbm [thread:$0]  (%p1747_p5), %s1648_s10, 256, %s1654_s19, %s688_s11, %s1309_s25, %s1309_s25, %s1310_s12  }
 0x3dc PF: > { %p985_p12 = scmp.ge.s32.totalorder %s1297_s22, 2  ;;  %s720_s23 = sand.u32 1, %s1269_s15  }
 0x3dd   : > { %p1748_p10 = scmp.ne.s32.totalorder %s1735_s8, 0  ;;  %s721_s30 = scalar_lea.sflag [#allocation7], %s720_s23 }
 0x3df   : > { %p981_p4 = pnand %p985_p12, %p1748_p10 }
 0x3e1   : > { %1264 = dma.done.wait (!%p981_p4), %s721_s30, 256  }
 0x3e2   : > { %1266 = vsyncadd (!%p981_p4), %s721_s30, 4294967040  ;;  %s26_s22 = sadd.s32 1, %s1297_s22   ;;  %s1749_s17 = sld [smem:[#allocation18_spill]] }
 0x3e3   : > { %p23_p6 = scmp.ge.s32.totalorder %s26_s22, 10   ;;  %s1750_s20 = sld [smem:[#allocation23_spill]] }
 0x3e4   : > { %s1751_s18 = sld [smem:[#allocation19_spill]]  ;;  %s1752_s19 = sld [smem:[#allocation20_spill]] }
 0x3e5   : > { %s1753_s5 = sld [smem:[#allocation21_spill]]  ;;  %s1754_s21 = sld [smem:[#allocation22_spill]] }
 0x3e6   : > { %s1755_s15 = smov %s1273_s16  ;;  %25 = sbr.rel (!%p23_p6) target bundleno = 14 (0xe), region = 126 }
 0x3e8   : > { %s1756_s16 = smov %s1749_s17 }
 0x3e9   : > { %s1757_s17 = smov %s1750_s20 }
 0x3eb   : > { %s1758_s20 = smov %s1753_s5 }
 0x3ed   :  { %726 = vsyncpa [#allocation6], 1 }
 0x3ee   :  { %728 = vsyncpa [#allocation6 + $0x1], 1 }
 0x3ef   :  { %729 = vsyncpa [#allocation9], 1 }
 0x3f0   :  { %731 = vsyncpa [#allocation9 + $0x1], 1 }
 0x3f1   :  { %732 = vsyncpa [#allocation12], 1 }
 0x3f2   :  { %734 = vsyncpa [#allocation12 + $0x1], 1 }
 0x3f3   :  { %735 = vsyncpa [#allocation7], 1 }
 0x3f4   :  { %737 = vsyncpa [#allocation7 + $0x1], 1 }

</bundles_post_ra>
